<compile_context>
chip_gen: v6e
topology: v6e:2x2x1
jax: 0.10.0
libtpu: 0.0.40
codegen_flags: <defaults>
</compile_context>

<pallas_src>
import functools

import jax
import jax.numpy as jnp
from jax.experimental import pallas as pl
from jax.experimental.pallas import tpu as pltpu


def _hard_binary_conv_kernel(x_ref, w_ref, s_ref, o_ref, patch_ref, *, kh, kw, w_pad):
    """One batch element per grid step.

    x_ref:     (1, C_in, L_in)    zero-padded input, padded spatial dims flattened row-major
    w_ref:     (C_out, K)         sign(W), tap-major / channel-minor ordering
    s_ref:     (C_out, 1)         per-output-channel scaling (mean |W|)
    o_ref:     (1, C_out, L_out)  output over the padded-width spatial grid
    patch_ref: (K, L_out)         VMEM scratch: im2col patch matrix built in-kernel
    """
    c_in = x_ref.shape[1]
    l_out = o_ref.shape[2]

    # Build the (K, L_out) patch matrix from KH*KW overlapping lane slices of the
    # flattened padded image (halo handled in VMEM -> no 9x im2col HBM traffic).
    for t in range(kh * kw):
        dh, dw = divmod(t, kw)
        start = dh * w_pad + dw                       # static offset
        patch_ref[pl.ds(t * c_in, c_in), :] = x_ref[0, :, pl.ds(start, l_out)]

    # Single fused K = C_in*KH*KW contraction on the MXU, f32 accumulation.
    y = jnp.dot(w_ref[...], patch_ref[...], preferred_element_type=jnp.float32)

    # Majority_Voter forward == sign(y) (the STE polynomial cancels); fold in the
    # per-channel scale with a single (C_out, 1) -> lane broadcast.
    o_ref[0] = jnp.where(y >= 0.0, 1.0, -1.0) * s_ref[...]


def hard_binary_conv(x_nchw, weight_oihw, *, a=1.0, stride=1, padding=1):
    if stride != 1:
        # TODO(synk): stride > 1 not implemented (module default is stride=1).
        raise NotImplementedError("only stride=1 supported")
    del a  # forward value is independent of `a`: the STE polynomial cancels exactly (to fp rounding)

    N, C_in, H, W = x_nchw.shape
    C_out, C_in_w, KH, KW = weight_oihw.shape
    assert C_in == C_in_w

    H_out = H + 2 * padding - KH + 1
    W_out = W + 2 * padding - KW + 1
    W_pad = W + 2 * padding
    K = C_in * KH * KW
    # Outputs are computed over the padded width (W_pad lanes per row); the extra
    # (W_pad - W_out) garbage columns per row are sliced off in the wrapper.
    L_out = H_out * W_pad
    # One extra padded row at the bottom so the largest tap's lane slice stays in-bounds.
    H_rows = H + 2 * padding + 1
    L_in = H_rows * W_pad

    # --- parameter preprocessing (tiny) ---
    scaling = jnp.mean(jnp.abs(weight_oihw), axis=(1, 2, 3)).astype(jnp.float32)
    s = scaling.reshape(C_out, 1)
    # sign(W), reordered tap-major / channel-minor to match the in-kernel patch rows.
    # Kept f32: bf16 halves traffic but can flip sign(y) for near-zero conv outputs.
    w2 = (jnp.sign(weight_oihw).astype(jnp.float32)
          .transpose(0, 2, 3, 1)              # (C_out, KH, KW, C_in)
          .reshape(C_out, K))

    # --- single zero-pad pass + free reshape (replaces the 9x im2col HBM expansion) ---
    xp = jnp.pad(x_nchw.astype(jnp.float32),
                 ((0, 0), (0, 0), (padding, padding + 1), (padding, padding)))
    x_flat = xp.reshape(N, C_in, L_in)

    kernel = functools.partial(_hard_binary_conv_kernel, kh=KH, kw=KW, w_pad=W_pad)

    # Grid over the batch: automatic double-buffered HBM<->VMEM pipelining; on v7x the
    # "parallel" axis shards steps across both TensorCores.
    # TODO(synk): at production H/W add a second grid axis tiling L_out into
    # multiple-of-128 lane blocks and re-derive block sizes against v7x's 64 MiB VMEM /
    # v5e's 16 MiB scoped default (per-step working set here is only ~60 KiB).
    out_flat = pl.pallas_call(
        kernel,
        out_shape=jax.ShapeDtypeStruct((N, C_out, L_out), jnp.float32),
        grid=(N,),
        in_specs=[
            pl.BlockSpec((1, C_in, L_in), lambda n: (n, 0, 0)),   # padded x, one image/step
            pl.BlockSpec((C_out, K), lambda n: (0, 0)),           # weights: resident across steps
            pl.BlockSpec((C_out, 1), lambda n: (0, 0)),           # scale:   resident across steps
        ],
        out_specs=pl.BlockSpec((1, C_out, L_out), lambda n: (n, 0, 0)),
        scratch_shapes=[pltpu.VMEM((K, L_out), jnp.float32)],
        compiler_params=pltpu.CompilerParams(dimension_semantics=("parallel",)),
    )(x_flat, w2, s)

    # Drop the padded-width garbage columns; reshape is free, slice is a tiny copy.
    return out_flat.reshape(N, C_out, H_out, W_pad)[:, :, :, :W_out]


def _reference(x, weight, *, a=1.0):
    """Pure-JAX reference matching the PyTorch forward pass (incl. the STE sequence)."""
    C_out = weight.shape[0]
    scaling = jnp.mean(jnp.abs(weight), axis=(1, 2, 3)).reshape(1, C_out, 1, 1)
    bw = jnp.sign(weight)
    y = jax.lax.conv_general_dilated(
        x, bw, window_strides=(1, 1), padding=((1, 1), (1, 1)),
        dimension_numbers=("NCHW", "OIHW", "NCHW"))
    out_fwd = jnp.where(y >= 0, 1.0, -1.0)
    xs = y / (C_out + a)
    m1 = (xs < -1.0).astype(jnp.float32)
    m2 = (xs < 0.0).astype(jnp.float32)
    m3 = (xs < 1.0).astype(jnp.float32)
    out1 = -1.0 * m1 + (xs * xs + 2.0 * xs) * (1.0 - m1)
    out2 = out1 * m2 + (-xs * xs + 2.0 * xs) * (1.0 - m2)
    out3 = out2 * m3 + 1.0 * (1.0 - m3)
    out = out_fwd - out3 + out3
    return scaling * out, y


if __name__ == "__main__":
    key = jax.random.PRNGKey(0)
    kx, kw = jax.random.split(key)

    # HardBinaryConv(in_chn=4, out_chn=8, kernel_size=3, stride=1, padding=1)
    N, C_in, H, W = 2, 4, 16, 16
    C_out, KSZ = 8, 3

    x = jax.random.normal(kx, (N, C_in, H, W), dtype=jnp.float32)
    # matches torch.rand(shape) * 0.001 (uniform in [0, 0.001))
    weight = jax.random.uniform(kw, (C_out, C_in, KSZ, KSZ), dtype=jnp.float32) * 0.001

    out = hard_binary_conv(x, weight, a=1.0, stride=1, padding=1)
    out = jax.block_until_ready(out)

    ref, y_ref = _reference(x, weight, a=1.0)
    assert out.shape == (N, C_out, H, W), out.shape
    # sign(y) is ill-conditioned at y ~= 0: kernel and XLA-conv reference may accumulate
    # in different orders, so allow sign flips only where the conv output is near zero.
    close = jnp.isclose(out, ref, atol=1e-5)
    near_zero = jnp.abs(y_ref) < 1e-4
    assert bool(jnp.all(close | near_zero)), float(jnp.max(jnp.abs(out - ref)))

    print("KERNEL_OK")
</pallas_src>

<mosaic_0001>
module attributes {stable_mosaic.version = 11 : i64} {
  func.func @_hard_binary_conv_kernel(%arg0: i32, %arg1: memref<1x4x342xf32, #tpu.memory_space<vmem>>, %arg2: memref<8x36xf32, #tpu.memory_space<vmem>>, %arg3: memref<8x1xf32, #tpu.memory_space<vmem>>, %arg4: memref<1x8x288xf32, #tpu.memory_space<vmem>>, %arg5: memref<36x288xf32, #tpu.memory_space<vmem>>) attributes {dimension_semantics = [#tpu.dimension_semantics<parallel>], iteration_bounds = array<i64: 2>, scalar_prefetch = 0 : i64, scratch_operands = 1 : i64, tpu.core_type = #tpu.core_type<tc>, window_params = [{transform_indices = @transform_0, window_bounds = array<i64: 1, 4, 342>}, {pipeline_mode = #tpu.pipeline_mode<synchronous>, transform_indices = @transform_1, window_bounds = array<i64: 8, 36>}, {pipeline_mode = #tpu.pipeline_mode<synchronous>, transform_indices = @transform_2, window_bounds = array<i64: 8, 1>}, {transform_indices = @transform_3, window_bounds = array<i64: 1, 8, 288>}]} {
    %c0 = arith.constant 0 : index
    %c0_0 = arith.constant 0 : index
    %c0_1 = arith.constant 0 : index
    %0 = vector.load %arg1[%c0, %c0_0, %c0_1] : memref<1x4x342xf32, #tpu.memory_space<vmem>>, vector<1x4x288xf32>
    %1 = vector.shape_cast %0 : vector<1x4x288xf32> to vector<4x288xf32>
    %c0_2 = arith.constant 0 : index
    %c0_3 = arith.constant 0 : index
    %2 = vector.load %arg5[%c0_2, %c0_3] : memref<36x288xf32, #tpu.memory_space<vmem>>, vector<4x288xf32>
    tpu.vector_store %arg5[%c0_2, %c0_3], %1 {strides = array<i32>} : memref<36x288xf32, #tpu.memory_space<vmem>>, vector<4x288xf32>,
    %c0_4 = arith.constant 0 : index
    %c0_5 = arith.constant 0 : index
    %c1 = arith.constant 1 : index
    %3 = vector.load %arg1[%c0_4, %c0_5, %c1] : memref<1x4x342xf32, #tpu.memory_space<vmem>>, vector<1x4x288xf32>
    %4 = vector.shape_cast %3 : vector<1x4x288xf32> to vector<4x288xf32>
    %c4 = arith.constant 4 : index
    %c0_6 = arith.constant 0 : index
    %5 = vector.load %arg5[%c4, %c0_6] : memref<36x288xf32, #tpu.memory_space<vmem>>, vector<4x288xf32>
    tpu.vector_store %arg5[%c4, %c0_6], %4 {strides = array<i32>} : memref<36x288xf32, #tpu.memory_space<vmem>>, vector<4x288xf32>,
    %c0_7 = arith.constant 0 : index
    %c0_8 = arith.constant 0 : index
    %c2 = arith.constant 2 : index
    %6 = vector.load %arg1[%c0_7, %c0_8, %c2] : memref<1x4x342xf32, #tpu.memory_space<vmem>>, vector<1x4x288xf32>
    %7 = vector.shape_cast %6 : vector<1x4x288xf32> to vector<4x288xf32>
    %c8 = arith.constant 8 : index
    %c0_9 = arith.constant 0 : index
    %8 = vector.load %arg5[%c8, %c0_9] : memref<36x288xf32, #tpu.memory_space<vmem>>, vector<4x288xf32>
    tpu.vector_store %arg5[%c8, %c0_9], %7 {strides = array<i32>} : memref<36x288xf32, #tpu.memory_space<vmem>>, vector<4x288xf32>,
    %c0_10 = arith.constant 0 : index
    %c0_11 = arith.constant 0 : index
    %c18 = arith.constant 18 : index
    %9 = vector.load %arg1[%c0_10, %c0_11, %c18] : memref<1x4x342xf32, #tpu.memory_space<vmem>>, vector<1x4x288xf32>
    %10 = vector.shape_cast %9 : vector<1x4x288xf32> to vector<4x288xf32>
    %c12 = arith.constant 12 : index
    %c0_12 = arith.constant 0 : index
    %11 = vector.load %arg5[%c12, %c0_12] : memref<36x288xf32, #tpu.memory_space<vmem>>, vector<4x288xf32>
    tpu.vector_store %arg5[%c12, %c0_12], %10 {strides = array<i32>} : memref<36x288xf32, #tpu.memory_space<vmem>>, vector<4x288xf32>,
    %c0_13 = arith.constant 0 : index
    %c0_14 = arith.constant 0 : index
    %c19 = arith.constant 19 : index
    %12 = vector.load %arg1[%c0_13, %c0_14, %c19] : memref<1x4x342xf32, #tpu.memory_space<vmem>>, vector<1x4x288xf32>
    %13 = vector.shape_cast %12 : vector<1x4x288xf32> to vector<4x288xf32>
    %c16 = arith.constant 16 : index
    %c0_15 = arith.constant 0 : index
    %14 = vector.load %arg5[%c16, %c0_15] : memref<36x288xf32, #tpu.memory_space<vmem>>, vector<4x288xf32>
    tpu.vector_store %arg5[%c16, %c0_15], %13 {strides = array<i32>} : memref<36x288xf32, #tpu.memory_space<vmem>>, vector<4x288xf32>,
    %c0_16 = arith.constant 0 : index
    %c0_17 = arith.constant 0 : index
    %c20 = arith.constant 20 : index
    %15 = vector.load %arg1[%c0_16, %c0_17, %c20] : memref<1x4x342xf32, #tpu.memory_space<vmem>>, vector<1x4x288xf32>
    %16 = vector.shape_cast %15 : vector<1x4x288xf32> to vector<4x288xf32>
    %c20_18 = arith.constant 20 : index
    %c0_19 = arith.constant 0 : index
    %17 = vector.load %arg5[%c20_18, %c0_19] : memref<36x288xf32, #tpu.memory_space<vmem>>, vector<4x288xf32>
    tpu.vector_store %arg5[%c20_18, %c0_19], %16 {strides = array<i32>} : memref<36x288xf32, #tpu.memory_space<vmem>>, vector<4x288xf32>,
    %c0_20 = arith.constant 0 : index
    %c0_21 = arith.constant 0 : index
    %c36 = arith.constant 36 : index
    %18 = vector.load %arg1[%c0_20, %c0_21, %c36] : memref<1x4x342xf32, #tpu.memory_space<vmem>>, vector<1x4x288xf32>
    %19 = vector.shape_cast %18 : vector<1x4x288xf32> to vector<4x288xf32>
    %c24 = arith.constant 24 : index
    %c0_22 = arith.constant 0 : index
    %20 = vector.load %arg5[%c24, %c0_22] : memref<36x288xf32, #tpu.memory_space<vmem>>, vector<4x288xf32>
    tpu.vector_store %arg5[%c24, %c0_22], %19 {strides = array<i32>} : memref<36x288xf32, #tpu.memory_space<vmem>>, vector<4x288xf32>,
    %c0_23 = arith.constant 0 : index
    %c0_24 = arith.constant 0 : index
    %c37 = arith.constant 37 : index
    %21 = vector.load %arg1[%c0_23, %c0_24, %c37] : memref<1x4x342xf32, #tpu.memory_space<vmem>>, vector<1x4x288xf32>
    %22 = vector.shape_cast %21 : vector<1x4x288xf32> to vector<4x288xf32>
    %c28 = arith.constant 28 : index
    %c0_25 = arith.constant 0 : index
    %23 = vector.load %arg5[%c28, %c0_25] : memref<36x288xf32, #tpu.memory_space<vmem>>, vector<4x288xf32>
    tpu.vector_store %arg5[%c28, %c0_25], %22 {strides = array<i32>} : memref<36x288xf32, #tpu.memory_space<vmem>>, vector<4x288xf32>,
    %c0_26 = arith.constant 0 : index
    %c0_27 = arith.constant 0 : index
    %c38 = arith.constant 38 : index
    %24 = vector.load %arg1[%c0_26, %c0_27, %c38] : memref<1x4x342xf32, #tpu.memory_space<vmem>>, vector<1x4x288xf32>
    %25 = vector.shape_cast %24 : vector<1x4x288xf32> to vector<4x288xf32>
    %c32 = arith.constant 32 : index
    %c0_28 = arith.constant 0 : index
    %26 = vector.load %arg5[%c32, %c0_28] : memref<36x288xf32, #tpu.memory_space<vmem>>, vector<4x288xf32>
    tpu.vector_store %arg5[%c32, %c0_28], %25 {strides = array<i32>} : memref<36x288xf32, #tpu.memory_space<vmem>>, vector<4x288xf32>,
    %c0_29 = arith.constant 0 : index
    %c0_30 = arith.constant 0 : index
    %27 = vector.load %arg2[%c0_29, %c0_30] : memref<8x36xf32, #tpu.memory_space<vmem>>, vector<8x36xf32>
    %c0_31 = arith.constant 0 : index
    %c0_32 = arith.constant 0 : index
    %28 = vector.load %arg5[%c0_31, %c0_32] : memref<36x288xf32, #tpu.memory_space<vmem>>, vector<36x288xf32>
    %cst = arith.constant dense<0.000000e+00> : vector<8x288xf32>
    %29 = tpu.matmul %27, %28, %cst {dimension_numbers = #tpu.dot_dimension_numbers<[1], [0], [0], [1], [0, 0, 1, 1], [], []>} : vector<8x36xf32>, vector<36x288xf32>, vector<8x288xf32> -> vector<8x288xf32>
    %cst_33 = arith.constant 0.000000e+00 : f32
    %30 = vector.broadcast %cst_33 : f32 to vector<8x288xf32>
    %31 = arith.cmpf oge, %29, %30 : vector<8x288xf32>
    %cst_34 = arith.constant 1.000000e+00 : f32
    %cst_35 = arith.constant -1.000000e+00 : f32
    %32 = vector.broadcast %cst_34 : f32 to vector<8x288xf32>
    %33 = vector.broadcast %cst_35 : f32 to vector<8x288xf32>
    %34 = arith.select %31, %32, %33 : vector<8x288xi1>, vector<8x288xf32>
    %c0_36 = arith.constant 0 : index
    %c0_37 = arith.constant 0 : index
    %35 = vector.load %arg3[%c0_36, %c0_37] : memref<8x1xf32, #tpu.memory_space<vmem>>, vector<8x1xf32>
    %36 = vector.broadcast %35 : vector<8x1xf32> to vector<8x288xf32>
    %37 = arith.mulf %34, %36 : vector<8x288xf32>
    %c0_38 = arith.constant 0 : index
    %c0_39 = arith.constant 0 : index
    %c0_40 = arith.constant 0 : index
    %38 = vector.load %arg4[%c0_38, %c0_39, %c0_40] : memref<1x8x288xf32, #tpu.memory_space<vmem>>, vector<1x8x288xf32>
    %39 = vector.shape_cast %38 : vector<1x8x288xf32> to vector<8x288xf32>
    %40 = vector.shape_cast %37 : vector<8x288xf32> to vector<1x8x288xf32>
    tpu.vector_store %arg4[%c0_38, %c0_39, %c0_40], %40 {strides = array<i32>} : memref<1x8x288xf32, #tpu.memory_space<vmem>>, vector<1x8x288xf32>,
    return
  }
  func.func @transform_0(%arg0: i32) -> (i32, i32, i32) {
    %c0_i32 = arith.constant 0 : i32
    %c0_i32_0 = arith.constant 0 : i32
    %c0_i32_1 = arith.constant 0 : i32
    return %arg0, %c0_i32, %c0_i32_0 : i32, i32, i32
  }
  func.func @transform_1(%arg0: i32) -> (i32, i32) {
    %c0_i32 = arith.constant 0 : i32
    %c0_i32_0 = arith.constant 0 : i32
    %c0_i32_1 = arith.constant 0 : i32
    return %c0_i32, %c0_i32_0 : i32, i32
  }
  func.func @transform_2(%arg0: i32) -> (i32, i32) {
    %c0_i32 = arith.constant 0 : i32
    %c0_i32_0 = arith.constant 0 : i32
    %c0_i32_1 = arith.constant 0 : i32
    return %c0_i32, %c0_i32_0 : i32, i32
  }
  func.func @transform_3(%arg0: i32) -> (i32, i32, i32) {
    %c0_i32 = arith.constant 0 : i32
    %c0_i32_0 = arith.constant 0 : i32
    %c0_i32_1 = arith.constant 0 : i32
    return %arg0, %c0_i32, %c0_i32_0 : i32, i32, i32
  }
}

</mosaic_0001>

<bundles_post_ra>
// kernel: tpu_custom_call.1
= control target key start
LH: loop header
LB: loop body
LE: loop exit
PB: predicated region body
PF: predicated region fallthrough
CT: control target
= control target key end

     0   :  { %8 = vsyncpa [#allocation4], 0  ;;  %s1039_s0 = inlined_call_operand.hbm [shape: f32[2,4,342], index: 0, kind: input, shape index: {}]   ;;  %s1040_s1 = inlined_call_operand.vmem [shape: f32[8,36], index: 1, kind: input, shape index: {}]   ;;  %s1041_s2 = inlined_call_operand.vmem [shape: f32[8,1], index: 2, kind: input, shape index: {}]   ;;  %s1042_s3 = inlined_call_operand.hbm [shape: f32[2,8,288], index: 3, kind: output, shape index: {}]  }
   0x1   :  { %10 = vsyncpa [#allocation4 + $0x1], 0 }
   0x2   :  { %11 = vsyncpa [#allocation5], 0 }
   0x3   :  { %13 = vsyncpa [#allocation5 + $0x1], 0  ;;  %s866_s12 = smov 0   ;;  %s868_s13 = smov 0  }
   0x4   :  { %s870_s14 = smov 0   ;;  %s872_s15 = smov 0  }
   0x5 LB: > { %s887_s16 = sadd.s32 4294967295, %s830_s15   ;;  %s636_s17 = sadd.s32 4294967294, %s830_s15   ;;  %s830_s15 = sphi %s872_s15, %s1058_s15   ;;  %s826_s14 = sphi %s870_s14, %s1057_s14   ;;  %s822_s13 = sphi %s868_s13, %s1056_s13   ;;  %s818_s12 = sphi %s866_s12, %s1055_s12  }
   0x6   : > { %s891_s18 = sadd.s32 1, %s830_s15   ;;  %s26_s19 = sadd.s32 1, %s826_s14 }
   0x7   : > { %s23_s20 = ssub.s32 %s830_s15, %s891_s18  ;;  %p33_p0 = scmp.ne.s32.totalorder %s826_s14, %s822_s13 }
   0x8   : > { %p24_p1 = scmp.eq.s32.totalorder %s23_s20, 0  ;;  %p34_p2 = scmp.eq.s32.totalorder %s830_s15, 0 }
   0x9   : > { %p39_p3 = scmp.ne.s32.totalorder %s822_s13, %s818_s12  ;;  %p40_p4 = scmp.eq.s32.totalorder %s887_s16, 0 }
   0xa   : > { %s903_s21 = scalar_select %p24_p1, %s826_s14, %s26_s19  }
   0xb   : > { %p35_p5 = por %p34_p2, %p33_p0  ;;  %p905_p6 = por %p40_p4, %p39_p3 }
   0xc   : > { %p105_p7 = scmp.eq.s32.totalorder %s887_s16, 1  ;;  %p111_p8 = scmp.eq.s32.totalorder %s636_s17, 1 }
   0xd   : > { %s1045_s22 = scalar_select %p905_p6, 1, 0 }
   0xe   : > { %p685_p10 = scmp.lt.s32.totalorder %s830_s15, 2  ;;  %p912_p11 = por %p105_p7, %p33_p0 }
   0xf   : > { %p916_p12 = por %p111_p8, %p39_p3  ;;  %s137_s25 = sand.u32 1, %s826_s14  }
  0x10   : > { %s1046_s23 = scalar_select %p912_p11, 1, 0 }
  0x11   : > { %s1047_s24 = scalar_select %p916_p12, 1, 0 }
  0x12   : > { %s669_s26 = smul.u32 192, %s830_s15  ;;  %p927_p13 = pnand %p685_p10, %p35_p5 }
  0x13   : > { %s668_s27 = smul.u32 12, %s137_s25  ;;  %s138_s7 = scalar_lea.sflag [#allocation4], %s137_s25 }
  0x14   : > { %s925_s30 = scalar_lea.hbm %s1039_s0, %s669_s26  ;;  %p740_p3 = pneg %p927_p13 }
  0x15   : > { %s141_s5 = scalar_lea.vmem [#allocation3], %s668_s27  ;;  %s738_s8 = scalar_lea.hbm %s925_s30, 192 }
  0x16   : > { %s149_s6 = sshll.u32 %s141_s5, 4  ;;  %p739_p2 = scmp.ne.s32.totalorder %s925_s30, %s738_s8  ;;  %s150_s6 = int_to_ptr.vmem [resolvable:$true] %s149_s6 }
  0x17   : > { %s743_s11 = scalar_lea.hbm %s1039_s0, 384  ;;  %p744_p5 = scmp.lt.s32.totalorder %s925_s30, %s1039_s0 }
  0x18   : > { %p741_p4 = pnand %p740_p3, %p739_p2  ;;  %p745_p8 = scmp.lt.s32.totalorder %s743_s11, %s738_s8 }
  0x1a   : > { %p742_p7 = pneg %p741_p4  ;;  %p746_p10 = por %p745_p8, %p744_p5 }
  0x1c   : > { %p747_p9 = pnand %p746_p10, %p742_p7 }
  0x1e   : > { %750 = shalt.err (!%p747_p9)
}
  0x1f   : > { %s751_s20 = scalar_lea.vmem %s150_s6, 192  ;;  %s832_s25 = smov [#allocation3]  }
  0x20   : > { %p752_p0 = scmp.ne.s32.totalorder %s150_s6, %s751_s20  ;;  %s756_s26 = sshll.u32 %s832_s25, 4  ;;  %s757_s26 = int_to_ptr.vmem [resolvable:$false] %s756_s26 }
  0x21   : > { %s758_s27 = scalar_lea.vmem %s757_s26, 384  ;;  %p759_p2 = scmp.lt.s32.totalorder %s150_s6, %s757_s26 }
  0x22   : > { %p754_p1 = pnand %p752_p0, %p740_p3  ;;  %p760_p4 = scmp.lt.s32.totalorder %s758_s27, %s751_s20 }
  0x24   : > { %p755_p12 = pneg %p754_p1  ;;  %p761_p11 = por %p760_p4, %p759_p2 }
  0x26   : > { %p762_p6 = pnand %p761_p11, %p755_p12 }
  0x28   : > { %765 = shalt.err (!%p762_p6)
}
  0x29   : > { %680 = dma.hbm_to_vmem [thread:$0]  (!%p927_p13), %s925_s30, 192, %s150_s6, %s138_s7  }
  0x2a   : > { %p1049_p9 = scmp.lt.s32.totalorder %s830_s15, 3  ;;  %p1050_p7 = scmp.ge.s32.totalorder %s830_s15, 1 }
  0x2c   : > { %p155_p5 = pnand %p1050_p7, %p1049_p9 }
  0x2d   : > { %s952_s28 = sand.u32 (!%p155_p5), 1, %s822_s13   ;;  %p1051_p6 = scmp.ne.s32.totalorder (!%p155_p5), %s1045_s22, 0 }
  0x2e   : > { %158 = sbr.rel (%p155_p5) target bundleno = 436 (0x1b4), region = 32  ;;  %s161_s5 = scalar_lea.sflag (!%p155_p5), [#allocation4], %s952_s28 }
  0x2f   : > { %s670_s29 = smul.u32 (!%p155_p5), 12, %s952_s28 }
  0x31   : > { %s956_s8 = scalar_lea.vmem (!%p155_p5), [#allocation3], %s670_s29 }
  0x33   : > { %809 = dma.done.wait (%p1051_p6), %s161_s5, 192  }
  0x34   : > { %811 = vsyncadd (%p1051_p6), %s161_s5, 4294967104  ;;  %v833_v0 = vmov 0.0   ;;  %v342_v1 = vld [vmem:[%s956_s8 + $0x8] sm:$0xf]  ;;  %v341_v2 = vld [vmem:[%s956_s8] sm:$0xff]  ;;  %s834_s30 = smov 90  }
  0x35   : > { %655 = vmatprep.subr.mxu1 %v833_v0  ;;  %455 = vmatprep.mubr.f32.mxu0 %v833_v0  ;;  %v345_v3 = vcombine.high %v341_v2, %v341_v2  ;;  %192 = vst [vmem:[#allocation2] sm:$0xf] %v341_v2  ;;  %v301_v4 = vld [vmem:[%s956_s8 + $0x8] sm:$0xf]  ;;  %vm194_vm0 = vcmask 257024   ;;  %s835_s22 = smov 91   ;;  %v324_v7 = vcombine.low %v341_v2, %v341_v2 }
  0x36   : > { %350 = vrot.lane.b32.xlu0 %v342_v1, %s834_s30  ;;  %346 = vrot.lane.b32.xlu1 %v341_v2, %s834_s30  ;;  %v188_v5 = vld [vmem:[%s956_s8 + $0x8] sm:$0xf]  ;;  %s836_s4 = smov 92   ;;  %s837_s6 = smov 109   ;;  %vm842_vm1 = vmmov 0   ;;  %v843_v13 = vmov 0  }
  0x37   : > { %193 = vst [vmem:[#allocation2 + $0x8] sm:$0xf] %v345_v3  ;;  %195 = vst.msk [vmem:[#allocation2 + $0x10] sm:$0xf] %vm194_vm0, %v188_v5  ;;  %v734_v6 = vld [vmem:[%s956_s8 + $0x8] ss:$0 sps:$4 sm:$0xff]   ;;  %665 = vmatprep.mubr.msk.f32.mxu1 %vm842_vm1, %v833_v0  ;;  %731 = vset.pattern.permute.xlu0 %v843_v13 }
  0x38   : > { %v260_v8 = vld [vmem:[%s956_s8 + $0x8] sm:$0xf]  ;;  %s838_s7 = smov 108   ;;  %s839_s9 = smov 126   ;;  %vm352_vm2 = vcmask 736256   ;;  %vm311_vm3 = vcmask 752640  }
  0x39   : > { %v735_v9 = vld [vmem:[%s956_s8 + $0x8] ss:$0 sps:$4 sm:$0xff]   ;;  %s840_s10 = smov 110   ;;  %s841_s11 = smov 127   ;;  %vm381_vm4 = vcmask 1043456   ;;  %vm216_vm5 = vcmask 261124  }
  0x3a   : > { %328 = vrot.lane.b32.xlu1 %v341_v2, %s835_s22  ;;  %309 = vrot.lane.b32.xlu0 %v301_v4, %s836_s4  ;;  %v219_v10 = vld [vmem:[%s956_s8 + $0x8] sm:$0xf]  ;;  %vm332_vm6 = vcmask 744448   ;;  %vm270_vm7 = vcmask 891904   ;;  %vm291_vm8 = vcmask 883712   ;;  %vm229_vm9 = vcmask 1031168  }
  0x3b   : > { %v736_v11 = vld [vmem:[%s956_s8 + $0x8] ss:$0 sps:$4 sm:$0xff]   ;;  %vm250_vm10 = vcmask 900096   ;;  %vm208_vm11 = vcmask 1039360   ;;  %vm377_vm12 = vcmask 293888   ;;  %s671_s26 = smul.u32 24, %s952_s28 }
  0x3c   : > { %v737_v12 = vld [vmem:[%s956_s8 + $0x8] ss:$0 sps:$4 sm:$0xff]   ;;  %vm549_vm14 = vcmask 261120   ;;  %s672_s27 = smul.u32 384, %s887_s16  ;;  %p1052_p12 = scmp.ne.s32.totalorder %s1046_s23, 0 }
  0x3d   : > { %v538_v14 = vld [vmem:[%s1041_s2] sm:$0xff]  ;;  %s186_s29 = scalar_lea.vmem [#allocation6], %s671_s26  ;;  %s845_s16 = smov [#allocation6]  }
  0x3e   : > { %348 = vrot.lane.b32.xlu0 %v345_v3, %s834_s30  ;;  %307 = vrot.lane.b32.xlu1 %v345_v3, %s836_s4  ;;  %v361_v4 = vld [vmem:[%s1040_s1] sm:$0xff]  ;;  %s566_s5 = sshll.u32 %s186_s29, 4  ;;  %s567_s5 = int_to_ptr.vmem [resolvable:$true] %s566_s5 }
  0x42   : > { %330 = vrot.lane.b32.xlu0 %v734_v6, %s835_s22  ;;  %305 = vrot.lane.b32.xlu1 %v341_v2, %s836_s4  ;;  %s552_s4 = scalar_lea.sflag [#allocation5], %s952_s28 }
  0x46   : > { %326 = vrot.lane.b32.xlu0 %v324_v7, %s835_s22  ;;  %266 = vrot.lane.b32.xlu1 %v345_v3, %s837_s6  ;;  %s564_s22 = scalar_lea.hbm %s1042_s3, %s672_s27 }
  0x4a   : > { %268 = vrot.lane.b32.xlu0 %v260_v8, %s837_s6  ;;  %287 = vrot.lane.b32.xlu1 %v341_v2, %s838_s7 }
  0x4e   : > { %289 = vrot.lane.b32.xlu0 %v735_v9, %s838_s7  ;;  %264 = vrot.lane.b32.xlu1 %v341_v2, %s837_s6  ;;  %s766_s6 = scalar_lea.vmem %s567_s5, 384 }
  0x4f   : > { %p767_p11 = scmp.ne.s32.totalorder %s567_s5, %s766_s6 }
  0x51   : > { %p768_p13 = pnand %p767_p11, %p1052_p12 }
  0x52   : > { %285 = vrot.lane.b32.xlu0 %v324_v7, %s838_s7  ;;  %225 = vrot.lane.b32.xlu1 %v345_v3, %s839_s9  ;;  %s770_s7 = sshll.u32 %s845_s16, 4  ;;  %s771_s7 = int_to_ptr.vmem [resolvable:$false] %s770_s7 }
  0x53   : > { %p769_p0 = pneg %p768_p13  ;;  %p773_p1 = scmp.lt.s32.totalorder %s567_s5, %s771_s7 }
  0x56   : > { %227 = vrot.lane.b32.xlu0 %v219_v10, %s839_s9  ;;  %246 = vrot.lane.b32.xlu1 %v341_v2, %s840_s10  ;;  %v844_v10 = vmov -1.0  }
  0x5a   : > { %248 = vrot.lane.b32.xlu0 %v736_v11, %s840_s10  ;;  %223 = vrot.lane.b32.xlu1 %v341_v2, %s839_s9  ;;  %s772_s9 = scalar_lea.vmem %s771_s7, 768 }
  0x5b   : > { %p774_p3 = scmp.lt.s32.totalorder %s772_s9, %s766_s6 }
  0x5d   : > { %p775_p8 = por %p774_p3, %p773_p1 }
  0x5e   : > { %244 = vrot.lane.b32.xlu0 %v324_v7, %s840_s10  ;;  %204 = vrot.lane.b32.xlu1 %v341_v2, %s841_s11 }
  0x5f   : > { %p776_p10 = pnand %p775_p8, %p769_p0 }
  0x62   : > { %206 = vrot.lane.b32.xlu0 %v737_v12, %s841_s11  ;;  %202 = vrot.lane.b32.xlu1 %v324_v7, %s841_s11 }
  0x66   : > { %541 = vperm.xlu0 %731, %v538_v14  }
  0xa8   : > { %v351_v15 = vpop.permute.xlu0 %350  ;;  %v347_v16 = vpop.permute.xlu1 %346 }
  0xa9   : > { %360 = vst.msk [vmem:[#allocation2 + $0x70] sm:$0xf] %vm194_vm0, %v351_v15 }
  0xac   : > { %v329_v17 = vpop.permute.xlu1 %328  ;;  %v310_v18 = vpop.permute.xlu0 %309 }
  0xad   : > { %319 = vst.msk [vmem:[#allocation2 + $0x58] sm:$0xf] %vm194_vm0, %v310_v18 }
  0xb0   : > { %v349_v19 = vpop.permute.xlu0 %348  ;;  %v308_v20 = vpop.permute.xlu1 %307  ;;  %v376_v21 = vld [vmem:[#allocation2 + $0x70] sm:$0xf] }
  0xb1   : > { %v353_v22 = vsel %vm352_vm2, %v347_v16, %v349_v19  ;;  %v354_v23 = vsel %vm352_vm2, %v349_v19, %v351_v15  ;;  %v313_v24 = vsel %vm311_vm3, %v308_v20, %v310_v18  ;;  %656 = vmatpush3.msk.msra.mxu1 %vm381_vm4, %v376_v21 }
  0xb2   : > { %358 = vst [vmem:[#allocation2 + $0x60] sm:$0xf] %v353_v22  ;;  %359 = vst [vmem:[#allocation2 + $0x68] sm:$0xf] %v354_v23  ;;  %657 = vmatprep.subr.mxu1 %v833_v0 }
  0xb3   : > { %318 = vst [vmem:[#allocation2 + $0x50] sm:$0xf] %v313_v24 }
  0xb4   : > { %v331_v25 = vpop.permute.xlu0 %330  ;;  %v306_v26 = vpop.permute.xlu1 %305 }
  0xb5   : > { %v334_v27 = vsel %vm332_vm6, %v329_v17, %v331_v25  ;;  %340 = vst.msk [vmem:[#allocation2 + $0x58] sm:$0xf0] %vm216_vm5, %v331_v25  ;;  %v312_v28 = vsel %vm311_vm3, %v306_v26, %v308_v20 }
  0xb6   : > { %339 = vst [vmem:[#allocation2 + $0x50] sm:$0xf0] %v334_v27  ;;  %317 = vst [vmem:[#allocation2 + $0x48] sm:$0xf] %v312_v28 }
  0xb8   : > { %v327_v29 = vpop.permute.xlu0 %326  ;;  %v267_v30 = vpop.permute.xlu1 %266 }
  0xb9   : > { %v333_v31 = vsel %vm332_vm6, %v327_v29, %v329_v17  ;;  %v375_v32 = vld [vmem:[#allocation2 + $0x68] sm:$0xf]  ;;  %v374_v33 = vld [vmem:[#allocation2 + $0x60] sm:$0xf] }
  0xba   : > { %338 = vst [vmem:[#allocation2 + $0x48] sm:$0xf0] %v333_v31  ;;  %641 = vmatprep.subr.msk.mxu0 %vm381_vm4, %v375_v32 }
  0xbb   : > { %642 = vmatpush1.msk.msra.mxu0 %vm381_vm4, %v374_v33 }
  0xbc   : > { %v269_v34 = vpop.permute.xlu0 %268  ;;  %v288_v35 = vpop.permute.xlu1 %287  ;;  %v373_v36 = vld [vmem:[#allocation2 + $0x58] sm:$0xff] }
  0xbd   : > { %v272_v37 = vsel %vm270_vm7, %v267_v30, %v269_v34  ;;  %278 = vst.msk [vmem:[#allocation2 + $0x40] sm:$0xf] %vm194_vm0, %v269_v34  ;;  %658 = vmatpush3.msra.mxu1 %v373_v36  ;;  %v372_v38 = vld [vmem:[#allocation2 + $0x50] sm:$0xff] }
  0xbe   : > { %277 = vst [vmem:[#allocation2 + $0x38] sm:$0xf] %v272_v37  ;;  %415 = vmatprep.subr.mxu0 %v372_v38  ;;  %659 = vmatprep.subr.mxu1 %v833_v0 }
  0xc0   : > { %v290_v39 = vpop.permute.xlu0 %289  ;;  %v265_v40 = vpop.permute.xlu1 %264 }
  0xc1   : > { %v293_v41 = vsel %vm291_vm8, %v288_v35, %v290_v39  ;;  %299 = vst.msk [vmem:[#allocation2 + $0x40] sm:$0xf0] %vm216_vm5, %v290_v39  ;;  %v271_v42 = vsel %vm270_vm7, %v265_v40, %v267_v30  ;;  %v371_v43 = vld [vmem:[#allocation2 + $0x48] sm:$0xff] }
  0xc2   : > { %298 = vst [vmem:[#allocation2 + $0x38] sm:$0xf0] %v293_v41  ;;  %276 = vst [vmem:[#allocation2 + $0x30] sm:$0xf] %v271_v42  ;;  %416 = vmatpush1.msra.mxu0 %v371_v43 }
  0xc4   : > { %v286_v44 = vpop.permute.xlu0 %285  ;;  %v226_v45 = vpop.permute.xlu1 %225 }
  0xc5   : > { %v292_v46 = vsel %vm291_vm8, %v286_v44, %v288_v35 }
  0xc6   : > { %297 = vst [vmem:[#allocation2 + $0x30] sm:$0xf0] %v292_v46 }
  0xc8   : > { %v228_v47 = vpop.permute.xlu0 %227  ;;  %v247_v48 = vpop.permute.xlu1 %246  ;;  %v370_v49 = vld [vmem:[#allocation2 + $0x40] sm:$0xff] }
  0xc9   : > { %v231_v50 = vsel %vm229_vm9, %v226_v45, %v228_v47  ;;  %237 = vst.msk [vmem:[#allocation2 + $0x28] sm:$0xf] %vm194_vm0, %v228_v47  ;;  %660 = vmatpush3.msra.mxu1 %v370_v49  ;;  %v369_v51 = vld [vmem:[#allocation2 + $0x38] sm:$0xff] }
  0xca   : > { %236 = vst [vmem:[#allocation2 + $0x20] sm:$0xf] %v231_v50  ;;  %417 = vmatprep.subr.mxu0 %v369_v51  ;;  %661 = vmatprep.subr.mxu1 %v833_v0 }
  0xcc   : > { %v249_v52 = vpop.permute.xlu0 %248  ;;  %v224_v53 = vpop.permute.xlu1 %223 }
  0xcd   : > { %v252_v54 = vsel %vm250_vm10, %v247_v48, %v249_v52  ;;  %258 = vst.msk [vmem:[#allocation2 + $0x28] sm:$0xf0] %vm216_vm5, %v249_v52  ;;  %v230_v55 = vsel %vm229_vm9, %v224_v53, %v226_v45  ;;  %v368_v56 = vld [vmem:[#allocation2 + $0x30] sm:$0xff] }
  0xce   : > { %257 = vst [vmem:[#allocation2 + $0x20] sm:$0xf0] %v252_v54  ;;  %235 = vst [vmem:[#allocation2 + $0x18] sm:$0xf] %v230_v55  ;;  %418 = vmatpush1.msra.mxu0 %v368_v56 }
  0xd0   : > { %v245_v57 = vpop.permute.xlu0 %244  ;;  %v205_v58 = vpop.permute.xlu1 %204 }
  0xd1   : > { %v251_v59 = vsel %vm250_vm10, %v245_v57, %v247_v48 }
  0xd2   : > { %256 = vst [vmem:[#allocation2 + $0x18] sm:$0xf0] %v251_v59 }
  0xd4   : > { %v207_v60 = vpop.permute.xlu0 %206  ;;  %v203_v61 = vpop.permute.xlu1 %202  ;;  %v367_v62 = vld [vmem:[#allocation2 + $0x28] sm:$0xff] }
  0xd5   : > { %v210_v63 = vsel %vm208_vm11, %v205_v58, %v207_v60  ;;  %217 = vst.msk [vmem:[#allocation2 + $0x10] sm:$0xf0] %vm216_vm5, %v207_v60  ;;  %v209_v1 = vsel %vm208_vm11, %v203_v61, %v205_v58  ;;  %662 = vmatpush3.msra.mxu1 %v367_v62  ;;  %v366_v2 = vld [vmem:[#allocation2 + $0x20] sm:$0xff] }
  0xd6   : > { %215 = vst [vmem:[#allocation2 + $0x8] sm:$0xf0] %v210_v63  ;;  %214 = vst [vmem:[#allocation2] sm:$0xf0] %v209_v1  ;;  %419 = vmatprep.subr.mxu0 %v366_v2  ;;  %663 = vmatprep.subr.mxu1 %v833_v0 }
  0xd9   : > { %v365_v3 = vld [vmem:[#allocation2 + $0x18] sm:$0xff] }
  0xda   : > { %420 = vmatpush1.msra.mxu0 %v365_v3 }
  0xdc   : > { %v364_v5 = vld [vmem:[#allocation2 + $0x10] sm:$0xff] }
  0xdd   : > { %664 = vmatpush3.msra.mxu1 %v364_v5  ;;  %v363_v6 = vld [vmem:[#allocation2 + $0x8] sm:$0xff]  ;;  %v362_v7 = vld [vmem:[#allocation2] sm:$0xff] }
  0xde   : > { %421 = vmatprep.subr.mxu0 %v363_v6  ;;  %666 = vmatmul.mubr.msk.f32.vlgmr.msra.gmra.mxu1 %vm377_vm12, %v361_v4 }
  0xdf   : > { %422 = vmatpush1.msra.mxu0 %v362_v7 }
  0xe0   : > { %643 = vmatmul.mubr.msk.f32.vlgmr.msra.gmra.mxu0 %vm377_vm12, %v361_v4 }
  0xe1   : > { %v542_v0 = vpop.permute.xlu0 %541 }
 0x19e   : > { %v528_v8 = vpop.f32.mrf.mxu1 }
 0x19f   : > { %vm534_vm13 = vcmp.ge.f32.partialorder %v528_v8, 0.0 }
 0x1a0   : > { %v457_v9 = vpop.f32.mrf.mxu0  ;;  %v537_v11 = vsel %vm534_vm13, 1.0, %v844_v10  ;;  %v667_v12 = vpop.f32.mrf.mxu1 }
 0x1a1   : > { %vm532_vm15 = vcmp.ge.f32.partialorder %v457_v9, 0.0  ;;  %v546_v13 = vmul.f32 %v542_v0, %v537_v11 }
 0x1a2   : > { %v535_v14 = vsel %vm532_vm15, 1.0, %v844_v10  ;;  %v459_v15 = vpop.f32.mrf.mxu0 }
 0x1a3   : > { %v544_v16 = vmul.f32 %v542_v0, %v535_v14  ;;  %550 = vst.msk [vmem:[%s186_s29 + $0x10] sm:$0xff] %vm549_vm14, %v546_v13  ;;  %vm533_vm0 = vcmp.ge.f32.partialorder %v459_v15, 0.0 }
 0x1a4   : > { %v536_v17 = vsel %vm533_vm0, 1.0, %v844_v10 }
 0x1a5   : > { %547 = vst [vmem:[%s186_s29] sm:$0xff] %v544_v16  ;;  %v545_v18 = vmul.f32 %v542_v0, %v536_v17 }
 0x1a7   : > { %548 = vst [vmem:[%s186_s29 + $0x8] sm:$0xff] %v545_v18 }
 0x1a8   : > { %779 = shalt.err (!%p776_p10)
}
 0x1a9   : > { %s780_s10 = scalar_lea.hbm %s564_s22, 384  ;;  %s784_s17 = scalar_lea.hbm %s1042_s3, 768 }
 0x1aa   : > { %p781_p2 = scmp.ne.s32.totalorder %s564_s22, %s780_s10  ;;  %p785_p7 = scmp.lt.s32.totalorder %s564_s22, %s1042_s3 }
 0x1ab   : > { %p786_p5 = scmp.lt.s32.totalorder %s784_s17, %s780_s10 }
 0x1ac   : > { %p782_p4 = pnand %p781_p2, %p1052_p12 }
 0x1ad   : > { %p787_p6 = por %p786_p5, %p785_p7 }
 0x1ae   : > { %p783_p9 = pneg %p782_p4 }
 0x1b0   : > { %p788_p11 = pnand %p787_p6, %p783_p9 }
 0x1b2   : > { %791 = shalt.err (!%p788_p11)
}
 0x1b3   : > { %675 = dma.vmem_to_hbm [thread:$0]  (%p1052_p12), %s567_s5, 384, %s564_s22, %s552_s4  }
 0x1b4 PF: > { %s578_s25 = sand.u32 1, %s818_s12   ;;  %p1053_p13 = scmp.ne.s32.totalorder %s1047_s24, 0 }
 0x1b5   : > { %p1054_p0 = scmp.ge.s32.totalorder %s830_s15, 2  ;;  %s579_s26 = scalar_lea.sflag [#allocation5], %s578_s25 }
 0x1b7   : > { %p682_p1 = pnand %p1054_p0, %p1053_p13 }
 0x1b9   : > { %p683_p3 = pneg %p682_p1 }
 0x1bb   : > { %813 = dma.done.wait (%p683_p3), %s579_s26, 384  }
 0x1bc   : > { %815 = vsyncadd (%p683_p3), %s579_s26, 4294966912  ;;  %p16_p8 = scmp.ge.s32.totalorder %s891_s18, 4   ;;  %s1055_s12 = smov %s822_s13 }
 0x1bd   : > { %s1056_s13 = smov %s826_s14  ;;  %s1057_s14 = smov %s903_s21 }
 0x1be   : > { %s1058_s15 = smov %s891_s18  ;;  %18 = sbr.rel (!%p16_p8) target bundleno = 5 (0x5), region = 77 }
 0x1c3   :  { %584 = vsyncpa [#allocation4], 1 }
 0x1c4   :  { %586 = vsyncpa [#allocation4 + $0x1], 1 }
 0x1c5   :  { %587 = vsyncpa [#allocation5], 1 }
 0x1c6   :  { %589 = vsyncpa [#allocation5 + $0x1], 1 }

</bundles_post_ra>
